<compile_context>
chip_gen: v7x
topology: tpu7x:2x2x1
jax: 0.10.0
libtpu: 0.0.40
codegen_flags: <defaults>
</compile_context>

<pallas_src>
import math
import functools

import jax
import jax.numpy as jnp
from jax.experimental import pallas as pl
from jax.experimental.pallas import tpu as pltpu


def build_pe_table(max_len: int, d_model: int) -> jnp.ndarray:
    """Sinusoidal positional-encoding table, identical math to the PyTorch init."""
    position = jnp.arange(0.0, max_len, dtype=jnp.float32)[:, None]          # (L, 1)
    div_term = jnp.exp(
        jnp.arange(0.0, d_model, 2.0, dtype=jnp.float32)
        * -(math.log(10000.0) / d_model)
    )                                                                         # (D/2,)
    pe = jnp.zeros((max_len, d_model), dtype=jnp.float32)
    pe = pe.at[:, 0::2].set(jnp.sin(position * div_term))
    pe = pe.at[:, 1::2].set(jnp.cos(position * div_term))
    return pe                                                                 # (L, D)


# ------------------------------- kernels ------------------------------------


def _pe_add_kernel(x_ref, pe_ref, o_ref):
    """Eval mode / p == 0:  out = x + pe.   x/o: (TR, TC), pe: (1, TC)."""
    y = x_ref[...].astype(jnp.float32) + pe_ref[...]
    o_ref[...] = y.astype(o_ref.dtype)


def _pe_add_dropout_kernel(x_ref, pe_ref, bits_ref, o_ref, *, threshold: int,
                           scale: float):
    """Training mode:  out = dropout(x + pe).

    keep iff bits >= threshold, so P(drop) = threshold / 2**32 ~= p.
    Kept elements are scaled by 1/(1-p).  Integer compare only -- no float
    conversion of the random bits.
    """
    y = x_ref[...].astype(jnp.float32) + pe_ref[...]
    keep = bits_ref[...] >= jnp.uint32(threshold)
    o_ref[...] = jnp.where(keep, y * jnp.float32(scale),
                           jnp.float32(0.0)).astype(o_ref.dtype)


# ---------------------------- tiling helpers ---------------------------------


def _largest_divisor_tile(dim: int, max_tile: int, align: int) -> int:
    """Largest multiple of `align` that divides `dim` and is <= max_tile.

    Falls back to the full dimension (always a legal BlockSpec extent).
    """
    if dim <= align or dim % align != 0:
        return dim
    units = dim // align
    cap = max(1, min(units, max_tile // align))
    for k in range(cap, 0, -1):
        if units % k == 0:
            return k * align
    return dim


_TARGET_BLOCK_ELEMS = 512 * 1024        # ~2 MiB of f32 per block per stream


# ------------------------------- wrapper -------------------------------------


def positional_encoding_forward(x, pe_table, *, p: float, dropout_key=None,
                                training: bool = True):
    """Pallas forward of PositionalEncoding.  x: (B, S, D), any float dtype."""
    B, S, D = x.shape
    N = S * D
    out_dtype = x.dtype

    # Lane-dense 2-D view: rows = batch, cols = flattened (seq, feature).
    x2 = x.reshape(B, N)
    pe_row = pe_table[:S, :].astype(jnp.float32).reshape(1, N)  # shared over batch

    # Rows first (sublane axis, multiple of 8 or full extent), then columns
    # (lane axis, multiple of 128) sized so one block is ~2 MiB.  Live VMEM is
    # ~2 bufs x 3 streams x 2 MiB + the tiny PE row block -> < 16 MiB, safe on
    # v5e/v6e (128 MiB physical) and v7x (64 MiB physical).
    row_tile = _largest_divisor_tile(B, 256, 8)
    col_cap = max(128, (_TARGET_BLOCK_ELEMS // max(row_tile, 1)) // 128 * 128)
    col_tile = _largest_divisor_tile(N, col_cap, 128)

    # Columns on the OUTER grid axis so the PE block index (which only depends
    # on the column) stays constant across all inner row steps -> one PE DMA
    # per column tile instead of one per (column, row) pair.
    grid = (pl.cdiv(N, col_tile), pl.cdiv(B, row_tile))

    x_spec = pl.BlockSpec((row_tile, col_tile), lambda c, r: (r, c))
    pe_spec = pl.BlockSpec((1, col_tile), lambda c, r: (0, c))
    out_spec = pl.BlockSpec((row_tile, col_tile), lambda c, r: (r, c))

    compiler_params = pltpu.CompilerParams(
        dimension_semantics=("parallel", "parallel"),   # elementwise: v7x megacore
        vmem_limit_bytes=32 * 1024 * 1024,
    )

    use_dropout = bool(training) and p > 0.0
    if not use_dropout:
        out2 = pl.pallas_call(
            _pe_add_kernel,
            out_shape=jax.ShapeDtypeStruct((B, N), out_dtype),
            grid=grid,
            in_specs=[x_spec, pe_spec],
            out_specs=out_spec,
            compiler_params=compiler_params,
        )(x2, pe_row)
        return out2.reshape(B, S, D)

    if dropout_key is None:
        dropout_key = jax.random.PRNGKey(0)
    # i.i.d. uint32 bits per element; independence holds under any retiling.
    bits = jax.random.bits(dropout_key, (B, N), dtype=jnp.uint32)
    threshold = min(int(round(p * float(2 ** 32))), 2 ** 32 - 1)
    scale = 1.0 / (1.0 - p)

    kernel = functools.partial(_pe_add_dropout_kernel, threshold=threshold,
                               scale=scale)
    out2 = pl.pallas_call(
        kernel,
        out_shape=jax.ShapeDtypeStruct((B, N), out_dtype),
        grid=grid,
        in_specs=[x_spec, pe_spec, x_spec],     # bits tiled exactly like x
        out_specs=out_spec,
        compiler_params=compiler_params,
    )(x2, pe_row, bits)
    return out2.reshape(B, S, D)


# --------------------------------- main ---------------------------------------


if __name__ == "__main__":
    # Small deterministic example consistent with the module's forward:
    # batch=2, seq=8, d_model=32, dropout p=0.1, max_len=64.
    B, S, D = 2, 8, 32
    MAX_LEN = 64
    P_DROP = 0.1

    root = jax.random.PRNGKey(0)
    k_x, k_drop = jax.random.split(root)
    x = jax.random.normal(k_x, (B, S, D), dtype=jnp.float32)
    pe_table = build_pe_table(MAX_LEN, D)

    ref = x + pe_table[None, :S, :]

    # Eval-mode semantics: out == x + pe exactly.
    out_eval = positional_encoding_forward(
        x, pe_table, p=P_DROP, dropout_key=k_drop, training=False)
    out_eval = jax.block_until_ready(out_eval)
    assert out_eval.shape == (B, S, D)
    assert jnp.allclose(out_eval, ref, atol=1e-6), "eval-mode mismatch"

    # Training mode: kept elements equal (x + pe) / (1 - p), dropped are 0.
    out_train = positional_encoding_forward(
        x, pe_table, p=P_DROP, dropout_key=k_drop, training=True)
    out_train = jax.block_until_ready(out_train)
    assert out_train.shape == (B, S, D)
    kept = out_train != 0.0
    expected = jnp.where(kept, ref / (1.0 - P_DROP), 0.0)
    assert jnp.allclose(jnp.where(kept, out_train, 0.0), expected,
                        rtol=1e-5, atol=1e-5), "train-mode mismatch"

    print("KERNEL_OK")
</pallas_src>

<mosaic_0001>
module attributes {stable_mosaic.version = 11 : i64} {
  func.func @_pe_add_kernel(%arg0: i32, %arg1: i32, %arg2: memref<2x256xf32, #tpu.memory_space<vmem>>, %arg3: memref<1x256xf32, #tpu.memory_space<vmem>>, %arg4: memref<2x256xf32, #tpu.memory_space<vmem>>) attributes {dimension_semantics = [#tpu.dimension_semantics<parallel>, #tpu.dimension_semantics<parallel>], iteration_bounds = array<i64: 1, 1>, scalar_prefetch = 0 : i64, scratch_operands = 0 : i64, tpu.core_type = #tpu.core_type<tc>, window_params = [{transform_indices = @transform_0, window_bounds = array<i64: 2, 256>}, {transform_indices = @transform_1, window_bounds = array<i64: 1, 256>}, {transform_indices = @transform_2, window_bounds = array<i64: 2, 256>}]} {
    %c0 = arith.constant 0 : index
    %c0_0 = arith.constant 0 : index
    %0 = vector.load %arg2[%c0, %c0_0] : memref<2x256xf32, #tpu.memory_space<vmem>>, vector<2x256xf32>
    %c0_1 = arith.constant 0 : index
    %c0_2 = arith.constant 0 : index
    %1 = vector.load %arg3[%c0_1, %c0_2] : memref<1x256xf32, #tpu.memory_space<vmem>>, vector<1x256xf32>
    %2 = vector.broadcast %1 : vector<1x256xf32> to vector<2x256xf32>
    %3 = arith.addf %0, %2 : vector<2x256xf32>
    %c0_3 = arith.constant 0 : index
    %c0_4 = arith.constant 0 : index
    %4 = vector.load %arg4[%c0_3, %c0_4] : memref<2x256xf32, #tpu.memory_space<vmem>>, vector<2x256xf32>
    tpu.vector_store %arg4[%c0_3, %c0_4], %3 {strides = array<i32>} : memref<2x256xf32, #tpu.memory_space<vmem>>, vector<2x256xf32>,
    return
  }
  func.func @transform_0(%arg0: i32, %arg1: i32) -> (i32, i32) {
    %c0_i32 = arith.constant 0 : i32
    return %arg1, %arg0 : i32, i32
  }
  func.func @transform_1(%arg0: i32, %arg1: i32) -> (i32, i32) {
    %c0_i32 = arith.constant 0 : i32
    %c0_i32_0 = arith.constant 0 : i32
    return %c0_i32, %arg0 : i32, i32
  }
  func.func @transform_2(%arg0: i32, %arg1: i32) -> (i32, i32) {
    %c0_i32 = arith.constant 0 : i32
    return %arg1, %arg0 : i32, i32
  }
}

</mosaic_0001>

<bundles_post_ra>
// kernel: tpu_custom_call.1
= control target key start
LH: loop header
LB: loop body
LE: loop exit
PB: predicated region body
PF: predicated region fallthrough
CT: control target
= control target key end

     0   :  { %7 = vsyncpa [#allocation3], 0  ;;  %s157_s0 = inlined_call_operand.hbm [shape: f32[2,256], index: 0, kind: input, shape index: {}]   ;;  %s158_s1 = inlined_call_operand.vmem [shape: f32[1,256], index: 1, kind: input, shape index: {}]   ;;  %s159_s2 = inlined_call_operand.hbm [shape: f32[2,256], index: 2, kind: output, shape index: {}]  }
   0x1   :  { %8 = vsyncpa [#allocation4], 0  ;;  %s112_s9 = smov [#allocation2]   ;;  %s64_s13 = scalar_lea.hbm %s157_s0, 64 }
   0x2   :  { %s15_s10 = sshll.u32 %s112_s9, 4  ;;  %p65_p0 = scmp.ne.s32.totalorder %s157_s0, %s64_s13  ;;  %s16_s10 = int_to_ptr.vmem [resolvable:$true] %s15_s10 }
   0x3   :  { %p68_p1 = scmp.lt.u32.totalorder %s64_s13, %s157_s0 }
   0x5   :  { %p70_p2 = pnand %p68_p1, %p65_p0 }
   0x7   :  { %73 = shalt.err (!%p70_p2)
}
   0x8   :  { %s74_s18 = scalar_lea.vmem %s16_s10, 64  ;;  %p79_p4 = scmp.lt.s32.totalorder %s16_s10, %s16_s10 }
   0x9   :  { %p75_p3 = scmp.ne.s32.totalorder %s16_s10, %s74_s18  ;;  %p80_p5 = scmp.lt.s32.totalorder %s74_s18, %s74_s18 }
   0xb   :  { %p81_p6 = por %p80_p5, %p79_p4 }
   0xd   :  { %p82_p7 = pnand %p81_p6, %p75_p3 }
   0xf   :  { %85 = shalt.err (!%p82_p7)
}
  0x10   :  { %18 = dma.hbm_to_vmem [thread:$0]  %s157_s0, 64, %s16_s10, [#allocation3]  }
  0x11   :  { %108 = dma.done.wait [#allocation3], 64  }
  0x12   :  { %109 = vsyncadd [#allocation3], 4294967232  ;;  %v27_v0 = vlaneseq  ;;  %v113_v1 = vmov 1983009808   ;;  %v25_v7 = vld [vmem:[%s158_s1] sm:$0x3] }
  0x13   :  { %v37_v2 = vunpack.c.l.s4 %v113_v1  ;;  %v24_v12 = vld [vmem:[#allocation2] sm:$0xf]  ;;  %s114_s23 = smov [#allocation5]  }
  0x14   :  { %v28_v3 = vshrl.u32 %v27_v0, 7  ;;  %s52_s0 = sshll.u32 %s114_s23, 4  ;;  %s53_s0 = int_to_ptr.vmem [resolvable:$true] %s52_s0 }
  0x15   :  { %v38_v6 = vunpack.c.0.s8 %v37_v2  ;;  %s86_s24 = scalar_lea.vmem %s53_s0, 64  ;;  %p91_p9 = scmp.lt.s32.totalorder %s53_s0, %s53_s0 }
  0x16   :  { %v29_v4 = vsub.s32 0, %v28_v3  ;;  %v33_v5 = vsub.s32 1, %v28_v3  ;;  %p87_p8 = scmp.ne.s32.totalorder %s53_s0, %s86_s24  ;;  %p92_p10 = scmp.lt.s32.totalorder %s86_s24, %s86_s24 }
  0x17   :  { %v41_v10 = vsub.s32 %v38_v6, %v28_v3 }
  0x18   :  { %v30_v8 = vrot.slane %v25_v7, %v29_v4  ;;  %v34_v9 = vrot.slane %v25_v7, %v33_v5  ;;  %p93_p11 = por %p92_p10, %p91_p9 }
  0x1a   :  { %v35_v11 = vcombine.low %v30_v8, %v34_v9  ;;  %p94_p12 = pnand %p93_p11, %p87_p8 }
  0x1c   :  { %v42_v13 = vrot.slane %v35_v11, %v41_v10 }
  0x1e   :  { %v44_v14 = vadd.f32 %v42_v13, %v24_v12 }
  0x20   :  { %45 = vst [vmem:[#allocation5] sm:$0xf] %v44_v14 }
  0x21   :  { %97 = shalt.err (!%p94_p12)
}
  0x22   :  { %s98_s26 = scalar_lea.hbm %s159_s2, 64 }
  0x23   :  { %p99_p13 = scmp.ne.s32.totalorder %s159_s2, %s98_s26  ;;  %p102_p0 = scmp.lt.u32.totalorder %s98_s26, %s159_s2 }
  0x25   :  { %p104_p1 = pnand %p102_p0, %p99_p13 }
  0x27   :  { %107 = shalt.err (!%p104_p1)
}
  0x28   :  { %55 = dma.vmem_to_hbm [thread:$0]  %s53_s0, 64, %s159_s2, [#allocation4]  }
  0x29   :  { %110 = dma.done.wait [#allocation4], 64  }
  0x2a   :  { %111 = vsyncadd [#allocation4], 4294967232 }
  0x2b   :  { %59 = vsyncpa [#allocation3], 1 }
  0x2c   :  { %60 = vsyncpa [#allocation4], 1 }

</bundles_post_ra>
